<compile_context>
chip_gen: v7x
topology: tpu7x:2x2x1
jax: 0.10.0
libtpu: 0.0.40
codegen_flags: <defaults>
</compile_context>

<pallas_src>
import functools

import jax
import jax.numpy as jnp
from jax.experimental import pallas as pl
from jax.experimental.pallas import tpu as pltpu


LEAKY_SLOPE = 0.2          # canonical GAN-genome LeakyReLU slope
OUT_PAD = 128              # final Linear padded to a lane-dense width
TB_LARGE = 512             # batch tile for the large-batch regime
SINGLE_TILE_MAX = 1024     # below this, run the whole (padded) batch as one tile


def _leaky_relu(x):
    return jnp.where(x > 0, x, LEAKY_SLOPE * x)


def phenotype_kernel(x_ref, w1_ref, b1_ref, w2_ref, b2_ref, w3_ref, b3_ref, o_ref):
    """Fused 3-layer MLP on one batch tile: (TB,D)->(TB,H1)->(TB,H2)->(TB,OUT_PAD)."""
    # x streams in as f32 (no wrapper-side cast/copy pass); cast to bf16 on the
    # VPU so the MXU sees bf16 operands with f32 accumulation.
    x = x_ref[...].astype(jnp.bfloat16)

    # Layer 1: bf16 MXU inputs, f32 accumulation, f32 bias add.
    h1 = jnp.dot(x, w1_ref[...], preferred_element_type=jnp.float32) + b1_ref[...]
    h1 = _leaky_relu(h1).astype(jnp.bfloat16)

    # Layer 2.
    h2 = jnp.dot(h1, w2_ref[...], preferred_element_type=jnp.float32) + b2_ref[...]
    h2 = _leaky_relu(h2).astype(jnp.bfloat16)

    # Output layer + sigmoid in f32; store lane-dense bf16 tile (unmasked vst).
    logits = jnp.dot(h2, w3_ref[...], preferred_element_type=jnp.float32) + b3_ref[...]
    o_ref[...] = jax.nn.sigmoid(logits).astype(o_ref.dtype)


def _round_up(n, m):
    return ((n + m - 1) // m) * m


def _spec(block_shape, index_map, buffers=None):
    """BlockSpec with an optional explicit pipeline depth (graceful fallback)."""
    if buffers is not None and hasattr(pl, "Buffered"):
        try:
            return pl.BlockSpec(block_shape, index_map,
                                pipeline_mode=pl.Buffered(buffers))
        except TypeError:
            pass
    return pl.BlockSpec(block_shape, index_map)


def _vmem_limit_bytes():
    # Generation-aware scoped-VMEM budget: ~75% of physical VMEM, capped at
    # 100 MiB (v5e/v6e: 128 MiB physical; v7x: 64 MiB per TensorCore).
    try:
        cap = int(pltpu.get_tpu_info().vmem_capacity_bytes)
    except Exception:
        cap = 64 << 20
    return min((cap * 3) // 4, 100 << 20)


def _choose_batch_tiling(batch):
    """Adaptive batch tile: one near-exact tile for small/medium batches,
    TB_LARGE pipelined (core-parallel) tiles for large batches."""
    if batch <= SINGLE_TILE_MAX:
        tb = _round_up(max(batch, 1), 16)   # 16 = bf16 sublane quantum
        return tb, tb, 1
    b_pad = _round_up(batch, TB_LARGE)
    return TB_LARGE, b_pad, b_pad // TB_LARGE


@functools.partial(jax.jit, static_argnames=("output_size",))
def phenotype_forward(x_nchw, params, output_size):
    """Forward pass of Phenotype.forward(x) -> self.model(x)."""
    w1, b1, w2, b2, w3p, b3p = params
    B = x_nchw.shape[0]
    D = 1
    for d in x_nchw.shape[1:]:
        D *= int(d)
    H1 = w1.shape[1]
    H2 = w2.shape[1]

    tb, b_pad, n_tiles = _choose_batch_tiling(B)

    # Glue: the Reshape((-1, next_input_size)) inserted by transform_genotype.
    # Reshape of a contiguous array is free; x stays f32 (cast happens in-kernel)
    # and is padded only for the ragged rows of the last tile.
    x_flat = x_nchw.reshape(B, D)
    if b_pad != B:
        x_flat = jnp.pad(x_flat, ((0, b_pad - B), (0, 0)))

    # Pipeline depths: weights/biases are grid-invariant -> single buffer; the
    # streamed x gets a 3rd buffer only when there are enough grid steps to
    # actually hide its DMA tail.
    x_buffers = 3 if n_tiles >= 3 else None

    out_pad = pl.pallas_call(
        phenotype_kernel,
        out_shape=jax.ShapeDtypeStruct((b_pad, OUT_PAD), jnp.bfloat16),
        grid_spec=pltpu.PrefetchScalarGridSpec(
            num_scalar_prefetch=0,
            grid=(n_tiles,),
            in_specs=[
                _spec((tb, D), lambda i: (i, 0), buffers=x_buffers),   # x (f32, streamed)
                _spec((D, H1), lambda i: (0, 0), buffers=1),           # W1 (bf16, resident)
                _spec((1, H1), lambda i: (0, 0), buffers=1),           # b1 (f32)
                _spec((H1, H2), lambda i: (0, 0), buffers=1),          # W2 (bf16, resident)
                _spec((1, H2), lambda i: (0, 0), buffers=1),           # b2 (f32)
                _spec((H2, OUT_PAD), lambda i: (0, 0), buffers=1),     # W3 padded (bf16)
                _spec((1, OUT_PAD), lambda i: (0, 0), buffers=1),      # b3 padded (f32)
            ],
            out_specs=_spec((tb, OUT_PAD), lambda i: (i, 0)),
        ),
        compiler_params=pltpu.CompilerParams(
            # Batch tiles are independent -> shard across v7x's 2 TensorCores.
            # TODO(synk): if "parallel" does not core-shard on a given toolchain,
            # switch to pltpu.CORE_PARALLEL / core_map with a leading core axis.
            dimension_semantics=("parallel",),
            vmem_limit_bytes=_vmem_limit_bytes(),
        ),
    )(x_flat, w1, b1, w2, b2, w3p, b3p)

    # Glue: drop batch padding and the lane padding of the final Linear; the
    # BCELoss consumer gets f32 probabilities of the true output_size.
    return out_pad[:B, :output_size].astype(jnp.float32)


def init_params(key, in_features, hidden1, hidden2, output_size, out_pad=OUT_PAD):
    """Deterministic parameter init (PyTorch-Linear-like uniform(-1/sqrt(fan_in), ...)).

    Weights are stored (in_features, out_features) in bf16 (halves weight DMA);
    biases stay f32 and are added to the f32 accumulator in-kernel.
    """
    ks = jax.random.split(key, 6)

    def lin(kw, kb, fan_in, fan_out):
        bound = 1.0 / jnp.sqrt(jnp.float32(fan_in))
        w = jax.random.uniform(kw, (fan_in, fan_out), jnp.float32, -bound, bound)
        b = jax.random.uniform(kb, (1, fan_out), jnp.float32, -bound, bound)
        return w, b

    w1, b1 = lin(ks[0], ks[1], in_features, hidden1)
    w2, b2 = lin(ks[2], ks[3], hidden1, hidden2)
    w3, b3 = lin(ks[4], ks[5], hidden2, output_size)

    # Pad the final (tiny) output dim up to a lane-dense width of 128 for the MXU;
    # padded columns are sliced off after the kernel (they only ever hold
    # sigmoid(pad_bias) and never reach the loss).
    w3p = jnp.zeros((hidden2, out_pad), jnp.float32).at[:, :output_size].set(w3)
    b3p = jnp.zeros((1, out_pad), jnp.float32).at[:, :output_size].set(b3)

    return (
        w1.astype(jnp.bfloat16), b1,
        w2.astype(jnp.bfloat16), b2,
        w3p.astype(jnp.bfloat16), b3p,
    )


def reference_forward(x_nchw, params, output_size):
    """Pure-JAX reference of the same phenotype model (same precision chain)."""
    w1, b1, w2, b2, w3p, b3p = params
    B = x_nchw.shape[0]
    x = x_nchw.reshape(B, -1).astype(jnp.bfloat16)
    h1 = _leaky_relu(jnp.dot(x, w1, preferred_element_type=jnp.float32) + b1)
    h1 = h1.astype(jnp.bfloat16)
    h2 = _leaky_relu(jnp.dot(h1, w2, preferred_element_type=jnp.float32) + b2)
    h2 = h2.astype(jnp.bfloat16)
    logits = jnp.dot(h2, w3p, preferred_element_type=jnp.float32) + b3p
    probs = jax.nn.sigmoid(logits).astype(jnp.bfloat16)
    return probs[:, :output_size].astype(jnp.float32)


if __name__ == "__main__":
    # Small shapes consistent with Phenotype(input_shape=(B, C, H, W), output_size=1).
    B, C, H, W = 2, 4, 16, 16
    OUTPUT_SIZE = 1        # discriminator-style int output_size
    HIDDEN1, HIDDEN2 = 256, 128
    IN_FEATURES = C * H * W

    key = jax.random.PRNGKey(0)
    k_x, k_p, k_x2 = jax.random.split(key, 3)

    x = jax.random.normal(k_x, (B, C, H, W), dtype=jnp.float32)
    params = init_params(k_p, IN_FEATURES, HIDDEN1, HIDDEN2, OUTPUT_SIZE)

    out = jax.block_until_ready(phenotype_forward(x, params, OUTPUT_SIZE))
    ref = jax.block_until_ready(reference_forward(x, params, OUTPUT_SIZE))
    assert out.shape == (B, OUTPUT_SIZE), out.shape
    assert jnp.allclose(out, ref, atol=1e-2, rtol=1e-2), (out, ref)

    # Also exercise the large-batch path (TB=512 tiles, 3-deep x pipeline,
    # ragged-tile padding) against the same reference.
    B2 = 1280
    x2 = jax.random.normal(k_x2, (B2, C, H, W), dtype=jnp.float32)
    out2 = jax.block_until_ready(phenotype_forward(x2, params, OUTPUT_SIZE))
    ref2 = jax.block_until_ready(reference_forward(x2, params, OUTPUT_SIZE))
    assert out2.shape == (B2, OUTPUT_SIZE), out2.shape
    assert jnp.allclose(out2, ref2, atol=1e-2, rtol=1e-2), (out2, ref2)

    print("KERNEL_OK")
</pallas_src>

<mosaic_0001>
module attributes {stable_mosaic.version = 11 : i64} {
  func.func @phenotype_kernel(%arg0: i32, %arg1: memref<16x1024xf32, #tpu.memory_space<vmem>>, %arg2: memref<1024x256xbf16, #tpu.memory_space<vmem>>, %arg3: memref<1x256xf32, #tpu.memory_space<vmem>>, %arg4: memref<256x128xbf16, #tpu.memory_space<vmem>>, %arg5: memref<1x128xf32, #tpu.memory_space<vmem>>, %arg6: memref<128x128xbf16, #tpu.memory_space<vmem>>, %arg7: memref<1x128xf32, #tpu.memory_space<vmem>>, %arg8: memref<16x128xbf16, #tpu.memory_space<vmem>>) attributes {dimension_semantics = [#tpu.dimension_semantics<parallel>], iteration_bounds = array<i64: 1>, scalar_prefetch = 0 : i64, scratch_operands = 0 : i64, tpu.core_type = #tpu.core_type<tc>, window_params = [{transform_indices = @transform_0, window_bounds = array<i64: 16, 1024>}, {pipeline_mode = #tpu.pipeline_mode<synchronous>, transform_indices = @transform_1, window_bounds = array<i64: 1024, 256>}, {pipeline_mode = #tpu.pipeline_mode<synchronous>, transform_indices = @transform_2, window_bounds = array<i64: 1, 256>}, {pipeline_mode = #tpu.pipeline_mode<synchronous>, transform_indices = @transform_3, window_bounds = array<i64: 256, 128>}, {pipeline_mode = #tpu.pipeline_mode<synchronous>, transform_indices = @transform_4, window_bounds = array<i64: 1, 128>}, {pipeline_mode = #tpu.pipeline_mode<synchronous>, transform_indices = @transform_5, window_bounds = array<i64: 128, 128>}, {pipeline_mode = #tpu.pipeline_mode<synchronous>, transform_indices = @transform_6, window_bounds = array<i64: 1, 128>}, {transform_indices = @transform_7, window_bounds = array<i64: 16, 128>}]} {
    %c0 = arith.constant 0 : index
    %c0_0 = arith.constant 0 : index
    %0 = vector.load %arg1[%c0, %c0_0] : memref<16x1024xf32, #tpu.memory_space<vmem>>, vector<16x1024xf32>
    %1 = arith.truncf %0 : vector<16x1024xf32> to vector<16x1024xbf16>
    %c0_1 = arith.constant 0 : index
    %c0_2 = arith.constant 0 : index
    %2 = vector.load %arg2[%c0_1, %c0_2] : memref<1024x256xbf16, #tpu.memory_space<vmem>>, vector<1024x256xbf16>
    %cst = arith.constant dense<0.000000e+00> : vector<16x256xf32>
    %3 = tpu.matmul %1, %2, %cst {dimension_numbers = #tpu.dot_dimension_numbers<[1], [0], [0], [1], [0, 0, 1, 1], [], []>} : vector<16x1024xbf16>, vector<1024x256xbf16>, vector<16x256xf32> -> vector<16x256xf32>
    %c0_3 = arith.constant 0 : index
    %c0_4 = arith.constant 0 : index
    %4 = vector.load %arg3[%c0_3, %c0_4] : memref<1x256xf32, #tpu.memory_space<vmem>>, vector<1x256xf32>
    %5 = vector.broadcast %4 : vector<1x256xf32> to vector<16x256xf32>
    %6 = arith.addf %3, %5 : vector<16x256xf32>
    %cst_5 = arith.constant 0.000000e+00 : f32
    %7 = vector.broadcast %cst_5 : f32 to vector<16x256xf32>
    %8 = arith.cmpf ogt, %6, %7 : vector<16x256xf32>
    %cst_6 = arith.constant 2.000000e-01 : f32
    %9 = vector.broadcast %cst_6 : f32 to vector<16x256xf32>
    %10 = arith.mulf %9, %6 : vector<16x256xf32>
    %11 = arith.select %8, %6, %10 : vector<16x256xi1>, vector<16x256xf32>
    %12 = arith.truncf %11 : vector<16x256xf32> to vector<16x256xbf16>
    %c0_7 = arith.constant 0 : index
    %c0_8 = arith.constant 0 : index
    %13 = vector.load %arg4[%c0_7, %c0_8] : memref<256x128xbf16, #tpu.memory_space<vmem>>, vector<256x128xbf16>
    %cst_9 = arith.constant dense<0.000000e+00> : vector<16x128xf32>
    %14 = tpu.matmul %12, %13, %cst_9 {dimension_numbers = #tpu.dot_dimension_numbers<[1], [0], [0], [1], [0, 0, 1, 1], [], []>} : vector<16x256xbf16>, vector<256x128xbf16>, vector<16x128xf32> -> vector<16x128xf32>
    %c0_10 = arith.constant 0 : index
    %c0_11 = arith.constant 0 : index
    %15 = vector.load %arg5[%c0_10, %c0_11] : memref<1x128xf32, #tpu.memory_space<vmem>>, vector<1x128xf32>
    %16 = vector.broadcast %15 : vector<1x128xf32> to vector<16x128xf32>
    %17 = arith.addf %14, %16 : vector<16x128xf32>
    %cst_12 = arith.constant 0.000000e+00 : f32
    %18 = vector.broadcast %cst_12 : f32 to vector<16x128xf32>
    %19 = arith.cmpf ogt, %17, %18 : vector<16x128xf32>
    %cst_13 = arith.constant 2.000000e-01 : f32
    %20 = vector.broadcast %cst_13 : f32 to vector<16x128xf32>
    %21 = arith.mulf %20, %17 : vector<16x128xf32>
    %22 = arith.select %19, %17, %21 : vector<16x128xi1>, vector<16x128xf32>
    %23 = arith.truncf %22 : vector<16x128xf32> to vector<16x128xbf16>
    %c0_14 = arith.constant 0 : index
    %c0_15 = arith.constant 0 : index
    %24 = vector.load %arg6[%c0_14, %c0_15] : memref<128x128xbf16, #tpu.memory_space<vmem>>, vector<128x128xbf16>
    %cst_16 = arith.constant dense<0.000000e+00> : vector<16x128xf32>
    %25 = tpu.matmul %23, %24, %cst_16 {dimension_numbers = #tpu.dot_dimension_numbers<[1], [0], [0], [1], [0, 0, 1, 1], [], []>} : vector<16x128xbf16>, vector<128x128xbf16>, vector<16x128xf32> -> vector<16x128xf32>
    %c0_17 = arith.constant 0 : index
    %c0_18 = arith.constant 0 : index
    %26 = vector.load %arg7[%c0_17, %c0_18] : memref<1x128xf32, #tpu.memory_space<vmem>>, vector<1x128xf32>
    %27 = vector.broadcast %26 : vector<1x128xf32> to vector<16x128xf32>
    %28 = arith.addf %25, %27 : vector<16x128xf32>
    %29 = arith.negf %28 : vector<16x128xf32>
    %30 = math.exp %29 : vector<16x128xf32>
    %cst_19 = arith.constant 1.000000e+00 : f32
    %31 = vector.broadcast %cst_19 : f32 to vector<16x128xf32>
    %32 = arith.addf %31, %30 : vector<16x128xf32>
    %33 = arith.divf %31, %32 : vector<16x128xf32>
    %34 = arith.truncf %33 : vector<16x128xf32> to vector<16x128xbf16>
    %c0_20 = arith.constant 0 : index
    %c0_21 = arith.constant 0 : index
    %35 = vector.load %arg8[%c0_20, %c0_21] : memref<16x128xbf16, #tpu.memory_space<vmem>>, vector<16x128xbf16>
    tpu.vector_store %arg8[%c0_20, %c0_21], %34 {strides = array<i32>} : memref<16x128xbf16, #tpu.memory_space<vmem>>, vector<16x128xbf16>,
    return
  }
  func.func @transform_0(%arg0: i32) -> (i32, i32) {
    %c0_i32 = arith.constant 0 : i32
    %c0_i32_0 = arith.constant 0 : i32
    return %arg0, %c0_i32 : i32, i32
  }
  func.func @transform_1(%arg0: i32) -> (i32, i32) {
    %c0_i32 = arith.constant 0 : i32
    %c0_i32_0 = arith.constant 0 : i32
    %c0_i32_1 = arith.constant 0 : i32
    return %c0_i32, %c0_i32_0 : i32, i32
  }
  func.func @transform_2(%arg0: i32) -> (i32, i32) {
    %c0_i32 = arith.constant 0 : i32
    %c0_i32_0 = arith.constant 0 : i32
    %c0_i32_1 = arith.constant 0 : i32
    return %c0_i32, %c0_i32_0 : i32, i32
  }
  func.func @transform_3(%arg0: i32) -> (i32, i32) {
    %c0_i32 = arith.constant 0 : i32
    %c0_i32_0 = arith.constant 0 : i32
    %c0_i32_1 = arith.constant 0 : i32
    return %c0_i32, %c0_i32_0 : i32, i32
  }
  func.func @transform_4(%arg0: i32) -> (i32, i32) {
    %c0_i32 = arith.constant 0 : i32
    %c0_i32_0 = arith.constant 0 : i32
    %c0_i32_1 = arith.constant 0 : i32
    return %c0_i32, %c0_i32_0 : i32, i32
  }
  func.func @transform_5(%arg0: i32) -> (i32, i32) {
    %c0_i32 = arith.constant 0 : i32
    %c0_i32_0 = arith.constant 0 : i32
    %c0_i32_1 = arith.constant 0 : i32
    return %c0_i32, %c0_i32_0 : i32, i32
  }
  func.func @transform_6(%arg0: i32) -> (i32, i32) {
    %c0_i32 = arith.constant 0 : i32
    %c0_i32_0 = arith.constant 0 : i32
    %c0_i32_1 = arith.constant 0 : i32
    return %c0_i32, %c0_i32_0 : i32, i32
  }
  func.func @transform_7(%arg0: i32) -> (i32, i32) {
    %c0_i32 = arith.constant 0 : i32
    %c0_i32_0 = arith.constant 0 : i32
    return %arg0, %c0_i32 : i32, i32
  }
}

</mosaic_0001>

<bundles_post_ra>
// kernel: phenotype_forward.1
= control target key start
LH: loop header
LB: loop body
LE: loop exit
PB: predicated region body
PF: predicated region fallthrough
CT: control target
= control target key end

     0   :  { %12 = vsyncpa [#allocation3], 0  ;;  %s1838_s24 = smov [#allocation2]   ;;  %s2036_s0 = inlined_call_operand.vmem [shape: f32[16,1024], index: 0, kind: input, shape index: {}]   ;;  %s2037_s1 = inlined_call_operand.hbm [shape: bf16[1024,256], index: 1, kind: input, shape index: {}]   ;;  %s2038_s2 = inlined_call_operand.vmem [shape: f32[1,256], index: 2, kind: input, shape index: {}]   ;;  %s2039_s3 = inlined_call_operand.vmem [shape: bf16[256,128], index: 3, kind: input, shape index: {}]   ;;  %s2040_s4 = inlined_call_operand.vmem [shape: f32[1,128], index: 4, kind: input, shape index: {}]   ;;  %s2041_s5 = inlined_call_operand.vmem [shape: bf16[128,128], index: 5, kind: input, shape index: {}]   ;;  %s2042_s6 = inlined_call_operand.vmem [shape: f32[1,128], index: 6, kind: input, shape index: {}]   ;;  %s2043_s7 = inlined_call_operand.vmem [shape: bf16[16,128], index: 7, kind: output, shape index: {}]  }
   0x1   :  { %s20_s25 = sshll.u32 %s1838_s24, 4  ;;  %s1814_s28 = scalar_lea.hbm %s2037_s1, 16384  ;;  %s21_s25 = int_to_ptr.vmem [resolvable:$true] %s20_s25 }
   0x2   :  { %p1815_p0 = scmp.ne.s32.totalorder %s2037_s1, %s1814_s28  ;;  %p1818_p1 = scmp.lt.u32.totalorder %s1814_s28, %s2037_s1 }
   0x4   :  { %p1820_p2 = pnand %p1818_p1, %p1815_p0 }
   0x6   :  { %1823 = shalt.err (!%p1820_p2)
}
   0x7   :  { %s1824_s10 = scalar_lea.vmem %s21_s25, 16384  ;;  %p1829_p4 = scmp.lt.s32.totalorder %s21_s25, %s21_s25 }
   0x8   :  { %p1825_p3 = scmp.ne.s32.totalorder %s21_s25, %s1824_s10  ;;  %p1830_p5 = scmp.lt.s32.totalorder %s1824_s10, %s1824_s10 }
   0xa   :  { %p1831_p6 = por %p1830_p5, %p1829_p4 }
   0xc   :  { %p1832_p7 = pnand %p1831_p6, %p1825_p3 }
   0xe   :  { %1835 = shalt.err (!%p1832_p7)
}
   0xf   :  { %s1839_s11 = smov 128   ;;  %s1840_s12 = smov 8  }
  0x10   :  { %26 = dma.hbm_to_vmem [thread:$0]  %s2037_s1, 16384, %s21_s25, [#allocation3], %s1839_s11, %s1839_s11, %s1840_s12  }
  0x11   :  { %1836 = dma.done.wait [#allocation3], 16384  }
  0x12   :  { %1837 = vsyncadd [#allocation3], 4294950912  ;;  %v1590_v0 = vld [vmem:[#allocation2 + $0x104] ss:$8 sps:$4 sm:$0xff]   ;;  %v1592_v1 = vld [vmem:[#allocation2 + $0x100] ss:$8 sps:$4 sm:$0xff]  }
  0x13   :  { %888 = vmatprep.subr.bf16.mxu0 %v1590_v0  ;;  %v1593_v2 = vld [vmem:[#allocation2 + $0x114] ss:$8 sps:$4 sm:$0xff]   ;;  %v1595_v3 = vld [vmem:[#allocation2 + $0x110] ss:$8 sps:$4 sm:$0xff]   ;;  %v1596_v4 = vld [vmem:[#allocation2 + $0x124] ss:$8 sps:$4 sm:$0xff]  }
  0x14   :  { %889 = vmatpush1.bf16.msra.mxu0 %v1592_v1  ;;  %v1598_v5 = vld [vmem:[#allocation2 + $0x120] ss:$8 sps:$4 sm:$0xff]   ;;  %v1599_v6 = vld [vmem:[#allocation2 + $0x134] ss:$8 sps:$4 sm:$0xff]   ;;  %v1601_v7 = vld [vmem:[#allocation2 + $0x130] ss:$8 sps:$4 sm:$0xff]  }
  0x15   :  { %890 = vmatprep.subr.bf16.mxu0 %v1593_v2  ;;  %v1602_v8 = vld [vmem:[#allocation2 + $0x144] ss:$8 sps:$4 sm:$0xff]   ;;  %v1604_v9 = vld [vmem:[#allocation2 + $0x140] ss:$8 sps:$4 sm:$0xff]   ;;  %v1605_v10 = vld [vmem:[#allocation2 + $0x154] ss:$8 sps:$4 sm:$0xff]  }
  0x16   :  { %v1607_v11 = vld [vmem:[#allocation2 + $0x150] ss:$8 sps:$4 sm:$0xff]   ;;  %v1608_v12 = vld [vmem:[#allocation2 + $0x164] ss:$8 sps:$4 sm:$0xff]   ;;  %v1610_v16 = vld [vmem:[#allocation2 + $0x160] ss:$8 sps:$4 sm:$0xff]  }
  0x17   :  { %v44_v13 = vld [vmem:[%s2036_s0 + $0x18] sm:$0xff]  ;;  %v1614_v19 = vld [vmem:[#allocation2 + $0x184] ss:$8 sps:$4 sm:$0xff]   ;;  %v1616_v20 = vld [vmem:[#allocation2 + $0x180] ss:$8 sps:$4 sm:$0xff]   ;;  %vm1842_vm4 = vmmov 0  }
  0x18   :  { %891 = vmatpush1.bf16.msra.mxu0 %v1595_v3  ;;  %v52_v14 = vld [vmem:[%s2036_s0 + $0x58] sm:$0xff]  ;;  %v1620_v23 = vld [vmem:[#allocation2 + $0x1a4] ss:$8 sps:$4 sm:$0xff]   ;;  %v1622_v24 = vld [vmem:[#allocation2 + $0x1a0] ss:$8 sps:$4 sm:$0xff]  }
  0x19   :  { %892 = vmatprep.subr.bf16.mxu0 %v1596_v4  ;;  %v60_v15 = vpack.c.bf16 %v52_v14, %v44_v13  ;;  %v1611_v17 = vld [vmem:[#allocation2 + $0x174] ss:$8 sps:$4 sm:$0xff]   ;;  %v1613_v18 = vld [vmem:[#allocation2 + $0x170] ss:$8 sps:$4 sm:$0xff]   ;;  %v1683_v27 = vld [vmem:[#allocation2 + $0x4] ss:$8 sps:$4 sm:$0xff]  }
  0x1a   :  { %v1617_v21 = vld [vmem:[#allocation2 + $0x194] ss:$8 sps:$4 sm:$0xff]   ;;  %v1619_v22 = vld [vmem:[#allocation2 + $0x190] ss:$8 sps:$4 sm:$0xff]   ;;  %v1685_v28 = vld [vmem:[#allocation2] ss:$8 sps:$4 sm:$0xff]   ;;  %845 = vmatprep.subr.bf16.mxu1 %v1683_v27 }
  0x1b   :  { %920 = vmatprep.mubr.bf16.mxu0 %v60_v15  ;;  %v1623_v25 = vld [vmem:[#allocation2 + $0x1b4] ss:$8 sps:$4 sm:$0xff]   ;;  %v1625_v26 = vld [vmem:[#allocation2 + $0x1b0] ss:$8 sps:$4 sm:$0xff]   ;;  %v1626_v29 = vld [vmem:[#allocation2 + $0x1c4] ss:$8 sps:$4 sm:$0xff]   ;;  %846 = vmatpush1.bf16.msra.mxu1 %v1685_v28 }
  0x1c   :  { %893 = vmatpush1.bf16.msra.mxu0 %v1598_v5  ;;  %v1689_v30 = vld [vmem:[#allocation2 + $0x14] ss:$8 sps:$4 sm:$0xff]   ;;  %v1691_v31 = vld [vmem:[#allocation2 + $0x10] ss:$8 sps:$4 sm:$0xff]   ;;  %v1628_v32 = vld [vmem:[#allocation2 + $0x1c0] ss:$8 sps:$4 sm:$0xff]  }
  0x1d   :  { %894 = vmatprep.subr.bf16.mxu0 %v1599_v6  ;;  %v1629_v33 = vld [vmem:[#allocation2 + $0x1d4] ss:$8 sps:$4 sm:$0xff]   ;;  %847 = vmatprep.subr.bf16.mxu1 %v1689_v30  ;;  %v1695_v34 = vld [vmem:[#allocation2 + $0x24] ss:$8 sps:$4 sm:$0xff]   ;;  %v1697_v35 = vld [vmem:[#allocation2 + $0x20] ss:$8 sps:$4 sm:$0xff]  }
  0x1e   :  { %v1631_v36 = vld [vmem:[#allocation2 + $0x1d0] ss:$8 sps:$4 sm:$0xff]   ;;  %v1632_v37 = vld [vmem:[#allocation2 + $0x1e4] ss:$8 sps:$4 sm:$0xff]   ;;  %v1701_v38 = vld [vmem:[#allocation2 + $0x34] ss:$8 sps:$4 sm:$0xff]  }
  0x1f   :  { %848 = vmatpush1.bf16.msra.mxu1 %v1691_v31  ;;  %v1703_v39 = vld [vmem:[#allocation2 + $0x30] ss:$8 sps:$4 sm:$0xff]   ;;  %v1634_v40 = vld [vmem:[#allocation2 + $0x1e0] ss:$8 sps:$4 sm:$0xff]   ;;  %v1707_v41 = vld [vmem:[#allocation2 + $0x44] ss:$8 sps:$4 sm:$0xff]  }
  0x20   :  { %895 = vmatpush1.bf16.msra.mxu0 %v1601_v7  ;;  %849 = vmatprep.subr.bf16.mxu1 %v1695_v34  ;;  %v1635_v42 = vld [vmem:[#allocation2 + $0x1f4] ss:$8 sps:$4 sm:$0xff]   ;;  %v1637_v43 = vld [vmem:[#allocation2 + $0x1f0] ss:$8 sps:$4 sm:$0xff]   ;;  %v1640_v45 = vld [vmem:[#allocation2 + $0x204] ss:$8 sps:$4 sm:$0xff]  }
  0x21   :  { %896 = vmatprep.subr.bf16.mxu0 %v1602_v8  ;;  %v43_v44 = vld [vmem:[%s2036_s0 + $0x10] sm:$0xff]  ;;  %v1709_v47 = vld [vmem:[#allocation2 + $0x40] ss:$8 sps:$4 sm:$0xff]   ;;  %v1719_v56 = vld [vmem:[#allocation2 + $0x64] ss:$8 sps:$4 sm:$0xff]  }
  0x22   :  { %v51_v46 = vld [vmem:[%s2036_s0 + $0x50] sm:$0xff]  ;;  %v46_v48 = vld [vmem:[%s2036_s0 + $0x28] sm:$0xff]  ;;  %v49_v34 = vld [vmem:[%s2036_s0 + $0x40] sm:$0xff] }
  0x23   :  { %850 = vmatpush1.bf16.msra.mxu1 %v1697_v35  ;;  %v1713_v49 = vld [vmem:[#allocation2 + $0x54] ss:$8 sps:$4 sm:$0xff]   ;;  %v54_v50 = vld [vmem:[%s2036_s0 + $0x68] sm:$0xff]  ;;  %v59_v51 = vpack.c.bf16 %v51_v46, %v43_v44  ;;  %v1715_v52 = vld [vmem:[#allocation2 + $0x50] ss:$8 sps:$4 sm:$0xff]  }
  0x24   :  { %897 = vmatpush1.bf16.msra.mxu0 %v1604_v9  ;;  %851 = vmatprep.subr.bf16.mxu1 %v1701_v38  ;;  %v1638_v53 = vld [vmem:[#allocation2 + $0x200] ss:$8 sps:$4 sm:$0xff]   ;;  %v1643_v54 = vld [vmem:[#allocation2 + $0x214] ss:$8 sps:$4 sm:$0xff]   ;;  %v62_v55 = vpack.c.bf16 %v54_v50, %v46_v48  ;;  %v1641_v58 = vld [vmem:[#allocation2 + $0x210] ss:$8 sps:$4 sm:$0xff]  }
  0x25   :  { %898 = vmatprep.subr.bf16.mxu0 %v1605_v10  ;;  %v1721_v57 = vld [vmem:[#allocation2 + $0x60] ss:$8 sps:$4 sm:$0xff]   ;;  %v1725_v59 = vld [vmem:[#allocation2 + $0x74] ss:$8 sps:$4 sm:$0xff]   ;;  %v1646_v60 = vld [vmem:[#allocation2 + $0x224] ss:$8 sps:$4 sm:$0xff]  }
  0x26   :  { %v1727_v61 = vld [vmem:[#allocation2 + $0x70] ss:$8 sps:$4 sm:$0xff]   ;;  %v1644_v62 = vld [vmem:[#allocation2 + $0x220] ss:$8 sps:$4 sm:$0xff]   ;;  %v1731_v63 = vld [vmem:[#allocation2 + $0x84] ss:$8 sps:$4 sm:$0xff]  }
  0x27   :  { %852 = vmatpush1.bf16.msra.mxu1 %v1703_v39  ;;  %v1649_v0 = vld [vmem:[#allocation2 + $0x234] ss:$8 sps:$4 sm:$0xff]   ;;  %v1733_v1 = vld [vmem:[#allocation2 + $0x80] ss:$8 sps:$4 sm:$0xff]   ;;  %v1647_v2 = vld [vmem:[#allocation2 + $0x230] ss:$8 sps:$4 sm:$0xff]  }
  0x28   :  { %899 = vmatpush1.bf16.msra.mxu0 %v1607_v11  ;;  %853 = vmatprep.subr.bf16.mxu1 %v1707_v41  ;;  %v1737_v3 = vld [vmem:[#allocation2 + $0x94] ss:$8 sps:$4 sm:$0xff]   ;;  %v1652_v4 = vld [vmem:[#allocation2 + $0x244] ss:$8 sps:$4 sm:$0xff]   ;;  %v1739_v5 = vld [vmem:[#allocation2 + $0x90] ss:$8 sps:$4 sm:$0xff]  }
  0x29   :  { %900 = vmatprep.subr.bf16.mxu0 %v1608_v12  ;;  %v1650_v6 = vld [vmem:[#allocation2 + $0x240] ss:$8 sps:$4 sm:$0xff]   ;;  %v1743_v7 = vld [vmem:[#allocation2 + $0xa4] ss:$8 sps:$4 sm:$0xff]   ;;  %v1655_v8 = vld [vmem:[#allocation2 + $0x254] ss:$8 sps:$4 sm:$0xff]  }
  0x2a   :  { %v1745_v9 = vld [vmem:[#allocation2 + $0xa0] ss:$8 sps:$4 sm:$0xff]   ;;  %v1653_v10 = vld [vmem:[#allocation2 + $0x250] ss:$8 sps:$4 sm:$0xff]   ;;  %v1749_v11 = vld [vmem:[#allocation2 + $0xb4] ss:$8 sps:$4 sm:$0xff]  }
  0x2b   :  { %854 = vmatpush1.bf16.msra.mxu1 %v1709_v47  ;;  %v1658_v12 = vld [vmem:[#allocation2 + $0x264] ss:$8 sps:$4 sm:$0xff]   ;;  %v1751_v13 = vld [vmem:[#allocation2 + $0xb0] ss:$8 sps:$4 sm:$0xff]   ;;  %v1656_v15 = vld [vmem:[#allocation2 + $0x260] ss:$8 sps:$4 sm:$0xff]  }
  0x2c   :  { %901 = vmatpush1.bf16.msra.mxu0 %v1610_v16  ;;  %855 = vmatprep.subr.bf16.mxu1 %v1713_v49  ;;  %v42_v14 = vld [vmem:[%s2036_s0 + $0x8] sm:$0xff]  ;;  %v1667_v27 = vld [vmem:[#allocation2 + $0x294] ss:$8 sps:$4 sm:$0xff]   ;;  %v1665_v28 = vld [vmem:[#allocation2 + $0x290] ss:$8 sps:$4 sm:$0xff]  }
  0x2d   :  { %902 = vmatprep.subr.bf16.mxu0 %v1611_v17  ;;  %v1755_v16 = vld [vmem:[#allocation2 + $0xc4] ss:$8 sps:$4 sm:$0xff]   ;;  %v1769_v30 = vld [vmem:[#allocation2 + $0xe0] ss:$8 sps:$4 sm:$0xff]   ;;  %v1773_v31 = vld [vmem:[#allocation2 + $0xf4] ss:$8 sps:$4 sm:$0xff]  }
  0x2e   :  { %v50_v17 = vld [vmem:[%s2036_s0 + $0x48] sm:$0xff]  ;;  %v1783_v38 = vld [vmem:[%s2039_s3] sm:$0xff]   ;;  %v1671_v39 = vld [vmem:[#allocation2 + $0x2b0] ss:$8 sps:$4 sm:$0xff]  }
  0x2f   :  { %856 = vmatpush1.bf16.msra.mxu1 %v1715_v52  ;;  %v1668_v35 = vld [vmem:[#allocation2 + $0x2a0] ss:$8 sps:$4 sm:$0xff]   ;;  %v1679_v46 = vld [vmem:[#allocation2 + $0x2d4] ss:$8 sps:$4 sm:$0xff]   ;;  %v1677_v48 = vld [vmem:[#allocation2 + $0x2d0] ss:$8 sps:$4 sm:$0xff]  }
  0x30   :  { %903 = vmatpush1.bf16.msra.mxu0 %v1613_v18  ;;  %857 = vmatprep.subr.bf16.mxu1 %v1719_v56  ;;  %v1661_v18 = vld [vmem:[#allocation2 + $0x274] ss:$8 sps:$4 sm:$0xff]   ;;  %v1784_v41 = vld [vmem:[%s2039_s3 + $0x48] sm:$0xff]   ;;  %v53_v56 = vld [vmem:[%s2036_s0 + $0x60] sm:$0xff] }
  0x31   :  { %904 = vmatprep.subr.bf16.mxu0 %v1614_v19  ;;  %v58_v19 = vpack.c.bf16 %v50_v17, %v42_v14  ;;  %v1674_v44 = vld [vmem:[#allocation2 + $0x2c0] ss:$8 sps:$4 sm:$0xff]   ;;  %v1787_v47 = vld [vmem:[%s2039_s3 + $0x10] sm:$0xff]   ;;  %v1788_v49 = vld [vmem:[%s2039_s3 + $0x58] sm:$0xff]  }
  0x32   :  { %v1682_v50 = vld [vmem:[#allocation2 + $0x2e4] ss:$8 sps:$4 sm:$0xff]   ;;  %v1680_v52 = vld [vmem:[#allocation2 + $0x2e0] ss:$8 sps:$4 sm:$0xff]  }
  0x33   :  { %858 = vmatpush1.bf16.msra.mxu1 %v1721_v57  ;;  %877 = vmatprep.mubr.bf16.mxu1 %v58_v19  ;;  %v1694_v57 = vld [vmem:[#allocation2 + $0x304] ss:$8 sps:$4 sm:$0xff]   ;;  %v1740_v14 = vld [vmem:[#allocation2 + $0x380] ss:$8 sps:$4 sm:$0xff]   ;;  %v1760_v19 = vld [vmem:[#allocation2 + $0x3b4] ss:$8 sps:$4 sm:$0xff]  }
  0x34   :  { %905 = vmatpush1.bf16.msra.mxu0 %v1616_v20  ;;  %859 = vmatprep.subr.bf16.mxu1 %v1725_v59  ;;  %v1659_v20 = vld [vmem:[#allocation2 + $0x270] ss:$8 sps:$4 sm:$0xff]   ;;  %v1754_v17 = vld [vmem:[#allocation2 + $0x3a4] ss:$8 sps:$4 sm:$0xff]  }
  0x35   :  { %906 = vmatprep.subr.bf16.mxu0 %v1617_v21  ;;  %v1757_v21 = vld [vmem:[#allocation2 + $0xc0] ss:$8 sps:$4 sm:$0xff]   ;;  %v56_v59 = vld [vmem:[%s2036_s0 + $0x78] sm:$0xff] }
  0x37   :  { %860 = vmatpush1.bf16.msra.mxu1 %v1727_v61  ;;  %v1692_v61 = vld [vmem:[#allocation2 + $0x300] ss:$8 sps:$4 sm:$0xff]  }
  0x38   :  { %907 = vmatpush1.bf16.msra.mxu0 %v1619_v22  ;;  %861 = vmatprep.subr.bf16.mxu1 %v1731_v63  ;;  %v1761_v22 = vld [vmem:[#allocation2 + $0xd4] ss:$8 sps:$4 sm:$0xff]  }
  0x39   :  { %908 = vmatprep.subr.bf16.mxu0 %v1620_v23  ;;  %v1664_v23 = vld [vmem:[#allocation2 + $0x284] ss:$8 sps:$4 sm:$0xff]   ;;  %v1700_v63 = vld [vmem:[#allocation2 + $0x314] ss:$8 sps:$4 sm:$0xff]  }
  0x3b   :  { %862 = vmatpush1.bf16.msra.mxu1 %v1733_v1  ;;  %v1706_v1 = vld [vmem:[#allocation2 + $0x324] ss:$8 sps:$4 sm:$0xff]  }
  0x3c   :  { %909 = vmatpush1.bf16.msra.mxu0 %v1622_v24  ;;  %863 = vmatprep.subr.bf16.mxu1 %v1737_v3  ;;  %v1662_v24 = vld [vmem:[#allocation2 + $0x280] ss:$8 sps:$4 sm:$0xff]   ;;  %v1712_v3 = vld [vmem:[#allocation2 + $0x334] ss:$8 sps:$4 sm:$0xff]  }
  0x3d   :  { %910 = vmatprep.subr.bf16.mxu0 %v1623_v25  ;;  %v1763_v25 = vld [vmem:[#allocation2 + $0xd0] ss:$8 sps:$4 sm:$0xff]  }
  0x3f   :  { %864 = vmatpush1.bf16.msra.mxu1 %v1739_v5  ;;  %v1718_v5 = vld [vmem:[#allocation2 + $0x344] ss:$8 sps:$4 sm:$0xff]  }
  0x40   :  { %911 = vmatpush1.bf16.msra.mxu0 %v1625_v26  ;;  %865 = vmatprep.subr.bf16.mxu1 %v1743_v7  ;;  %v1767_v26 = vld [vmem:[#allocation2 + $0xe4] ss:$8 sps:$4 sm:$0xff]   ;;  %v1724_v7 = vld [vmem:[#allocation2 + $0x354] ss:$8 sps:$4 sm:$0xff]  }
  0x41   :  { %912 = vmatprep.subr.bf16.mxu0 %v1626_v29  ;;  %v1670_v29 = vld [vmem:[#allocation2 + $0x2a4] ss:$8 sps:$4 sm:$0xff]  }
  0x43   :  { %866 = vmatpush1.bf16.msra.mxu1 %v1745_v9  ;;  %v1730_v9 = vld [vmem:[#allocation2 + $0x364] ss:$8 sps:$4 sm:$0xff]  }
  0x44   :  { %913 = vmatpush1.bf16.msra.mxu0 %v1628_v32  ;;  %867 = vmatprep.subr.bf16.mxu1 %v1749_v11  ;;  %v1775_v32 = vld [vmem:[#allocation2 + $0xf0] ss:$8 sps:$4 sm:$0xff]   ;;  %v1736_v11 = vld [vmem:[#allocation2 + $0x374] ss:$8 sps:$4 sm:$0xff]  }
  0x45   :  { %914 = vmatprep.subr.bf16.mxu0 %v1629_v33  ;;  %v41_v33 = vld [vmem:[%s2036_s0] sm:$0xff] }
  0x47   :  { %868 = vmatpush1.bf16.msra.mxu1 %v1751_v13  ;;  %v1742_v13 = vld [vmem:[#allocation2 + $0x384] ss:$8 sps:$4 sm:$0xff]  }
  0x48   :  { %915 = vmatpush1.bf16.msra.mxu0 %v1631_v36  ;;  %869 = vmatprep.subr.bf16.mxu1 %v1755_v16  ;;  %v1782_v36 = vld [vmem:[%s2039_s3 + $0x40] sm:$0xff]   ;;  %v1746_v16 = vld [vmem:[#allocation2 + $0x390] ss:$8 sps:$4 sm:$0xff]  }
  0x49   :  { %916 = vmatprep.subr.bf16.mxu0 %v1632_v37  ;;  %v1673_v37 = vld [vmem:[#allocation2 + $0x2b4] ss:$8 sps:$4 sm:$0xff]  }
  0x4b   :  { %870 = vmatpush1.bf16.msra.mxu1 %v1757_v21  ;;  %v1766_v21 = vld [vmem:[#allocation2 + $0x3c4] ss:$8 sps:$4 sm:$0xff]  }
  0x4c   :  { %917 = vmatpush1.bf16.msra.mxu0 %v1634_v40  ;;  %871 = vmatprep.subr.bf16.mxu1 %v1761_v22  ;;  %v57_v40 = vpack.c.bf16 %v49_v34, %v41_v33  ;;  %v1764_v22 = vld [vmem:[#allocation2 + $0x3c0] ss:$8 sps:$4 sm:$0xff]  }
  0x4d   :  { %918 = vmatprep.subr.bf16.mxu0 %v1635_v42  ;;  %v1676_v42 = vld [vmem:[#allocation2 + $0x2c4] ss:$8 sps:$4 sm:$0xff]  }
  0x4e   :  { %v1791_v33 = vld [vmem:[%s2039_s3 + $0x20] sm:$0xff]   ;;  %v1792_v34 = vld [vmem:[%s2039_s3 + $0x68] sm:$0xff]  }
  0x4f   :  { %872 = vmatpush1.bf16.msra.mxu1 %v1763_v25  ;;  %v1778_v25 = vld [vmem:[#allocation2 + $0x3e4] ss:$8 sps:$4 sm:$0xff]  }
  0x50   :  { %919 = vmatpush1.bf16.msra.mxu0 %v1637_v43  ;;  %873 = vmatprep.subr.bf16.mxu1 %v1767_v26  ;;  %v1785_v43 = vld [vmem:[%s2039_s3 + $0x8] sm:$0xff]  }
  0x51   :  { %931 = vmatprep.subr.bf16.mxu0 %v1640_v45  ;;  %v1786_v45 = vld [vmem:[%s2039_s3 + $0x50] sm:$0xff]   ;;  %v1776_v26 = vld [vmem:[#allocation2 + $0x3e0] ss:$8 sps:$4 sm:$0xff]  }
  0x53   :  { %921 = vmatmul.mubr.bf16.vlgmr.msra.gmra.mrb[0].mxu0 %v59_v51  ;;  %874 = vmatpush1.bf16.msra.mxu1 %v1769_v30  ;;  %v1789_v51 = vld [vmem:[%s2039_s3 + $0x18] sm:$0xff]   ;;  %v55_v30 = vld [vmem:[%s2036_s0 + $0x70] sm:$0xff] }
  0x54   :  { %932 = vmatpush1.bf16.msra.mxu0 %v1638_v53  ;;  %963 = vmatprep.mubr.bf16.mxu0 %v62_v55  ;;  %v1688_v53 = vld [vmem:[#allocation2 + $0x2f4] ss:$8 sps:$4 sm:$0xff]   ;;  %v45_v55 = vld [vmem:[%s2036_s0 + $0x20] sm:$0xff] }
  0x55   :  { %933 = vmatprep.subr.bf16.mxu0 %v1643_v54  ;;  %875 = vmatprep.subr.bf16.mxu1 %v1773_v31  ;;  %v1686_v54 = vld [vmem:[#allocation2 + $0x2f0] ss:$8 sps:$4 sm:$0xff]  }
  0x57   :  { %876 = vmatpush1.bf16.msra.mxu1 %v1775_v32  ;;  %v1790_v32 = vld [vmem:[%s2039_s3 + $0x60] sm:$0xff]  }
  0x58   :  { %934 = vmatpush1.bf16.msra.mxu0 %v1641_v58  ;;  %1518 = vmatprep.subr.bf16.mxu1 %v1782_v36  ;;  %v48_v58 = vld [vmem:[%s2036_s0 + $0x38] sm:$0xff]  ;;  %v1794_v36 = vld [vmem:[%s2039_s3 + $0x70] sm:$0xff]  }
  0x59   :  { %935 = vmatprep.subr.bf16.mxu0 %v1646_v60  ;;  %v61_v60 = vpack.c.bf16 %v53_v56, %v45_v55 }
  0x5a   :  { %878 = vmatmul.mubr.bf16.vlgmr.msra.gmra.mrb[0].mxu1 %v57_v40  ;;  %v1841_v40 = vmov 0.0  }
  0x5b   :  { %1519 = vmatpush3.bf16.msra.mxu1 %v1783_v38  ;;  %v1796_v38 = vld [vmem:[%s2039_s3 + $0x78] sm:$0xff]  }
  0x5c   :  { %936 = vmatpush1.bf16.msra.mxu0 %v1644_v62  ;;  %1520 = vmatprep.subr.bf16.mxu1 %v1784_v41  ;;  %v64_v62 = vpack.c.bf16 %v56_v59, %v48_v58 }
  0x5d   :  { %937 = vmatprep.subr.bf16.mxu0 %v1649_v0  ;;  %v1698_v0 = vld [vmem:[#allocation2 + $0x310] ss:$8 sps:$4 sm:$0xff]  }
  0x5f   :  { %1521 = vmatpush3.bf16.msra.mxu1 %v1785_v43 }
  0x60   :  { %938 = vmatpush1.bf16.msra.mxu0 %v1647_v2  ;;  %1522 = vmatprep.subr.bf16.mxu1 %v1786_v45  ;;  %v1704_v2 = vld [vmem:[#allocation2 + $0x320] ss:$8 sps:$4 sm:$0xff]   ;;  %v195_v45 = vlaneseq }
  0x61   :  { %939 = vmatprep.subr.bf16.mxu0 %v1652_v4  ;;  %v1710_v4 = vld [vmem:[#allocation2 + $0x330] ss:$8 sps:$4 sm:$0xff]  }
  0x63   :  { %1523 = vmatpush3.bf16.msra.mxu1 %v1787_v47 }
  0x64   :  { %940 = vmatpush1.bf16.msra.mxu0 %v1650_v6  ;;  %1524 = vmatprep.subr.bf16.mxu1 %v1788_v49  ;;  %v1716_v6 = vld [vmem:[#allocation2 + $0x340] ss:$8 sps:$4 sm:$0xff]  }
  0x65   :  { %941 = vmatprep.subr.bf16.mxu0 %v1655_v8  ;;  %v1722_v8 = vld [vmem:[#allocation2 + $0x350] ss:$8 sps:$4 sm:$0xff]  }
  0x67   :  { %1525 = vmatpush3.bf16.msra.mxu1 %v1789_v51 }
  0x68   :  { %942 = vmatpush1.bf16.msra.mxu0 %v1653_v10  ;;  %v1728_v10 = vld [vmem:[#allocation2 + $0x360] ss:$8 sps:$4 sm:$0xff]   ;;  %1526 = vmatprep.subr.bf16.mxu1 %v1790_v32 }
  0x69   :  { %943 = vmatprep.subr.bf16.mxu0 %v1658_v12  ;;  %v1734_v12 = vld [vmem:[#allocation2 + $0x370] ss:$8 sps:$4 sm:$0xff]   ;;  %v1498_v32 = vld [vmem:[%s2042_s6] ss:$0 sm:$0xff] }
  0x6b   :  { %1527 = vmatpush3.bf16.msra.mxu1 %v1791_v33 }
  0x6c   :  { %944 = vmatpush1.bf16.msra.mxu0 %v1656_v15  ;;  %v1748_v15 = vld [vmem:[#allocation2 + $0x394] ss:$8 sps:$4 sm:$0xff]   ;;  %1528 = vmatprep.subr.bf16.mxu1 %v1792_v34 }
  0x6d   :  { %945 = vmatprep.subr.bf16.mxu0 %v1661_v18  ;;  %v1752_v18 = vld [vmem:[#allocation2 + $0x3a0] ss:$8 sps:$4 sm:$0xff]  }
  0x70   :  { %946 = vmatpush1.bf16.msra.mxu0 %v1659_v20  ;;  %v1758_v20 = vld [vmem:[#allocation2 + $0x3b0] ss:$8 sps:$4 sm:$0xff]  }
  0x71   :  { %947 = vmatprep.subr.bf16.mxu0 %v1664_v23  ;;  %v1772_v23 = vld [vmem:[#allocation2 + $0x3d4] ss:$8 sps:$4 sm:$0xff]  }
  0x74   :  { %948 = vmatpush1.bf16.msra.mxu0 %v1662_v24  ;;  %v1770_v24 = vld [vmem:[#allocation2 + $0x3d0] ss:$8 sps:$4 sm:$0xff]  }
  0x75   :  { %949 = vmatprep.subr.bf16.mxu0 %v1667_v27  ;;  %v1781_v27 = vld [vmem:[#allocation2 + $0x3f4] ss:$8 sps:$4 sm:$0xff]  }
  0x78   :  { %950 = vmatpush1.bf16.msra.mxu0 %v1665_v28  ;;  %v1779_v28 = vld [vmem:[#allocation2 + $0x3f0] ss:$8 sps:$4 sm:$0xff]  }
  0x79   :  { %951 = vmatprep.subr.bf16.mxu0 %v1670_v29  ;;  %v47_v29 = vld [vmem:[%s2036_s0 + $0x30] sm:$0xff] }
  0x7a   :  { %v63_v31 = vpack.c.bf16 %v55_v30, %v47_v29 }
  0x7c   :  { %952 = vmatpush1.bf16.msra.mxu0 %v1668_v35  ;;  %v1793_v35 = vld [vmem:[%s2039_s3 + $0x28] sm:$0xff]  }
  0x7d   :  { %953 = vmatprep.subr.bf16.mxu0 %v1673_v37  ;;  %1529 = vmatpush3.bf16.msra.mxu1 %v1793_v35  ;;  %v1795_v37 = vld [vmem:[%s2039_s3 + $0x30] sm:$0xff]  }
  0x7e   :  { %1530 = vmatprep.subr.bf16.mxu1 %v1794_v36 }
  0x80   :  { %954 = vmatpush1.bf16.msra.mxu0 %v1671_v39  ;;  %v1797_v39 = vld [vmem:[%s2039_s3 + $0x38] sm:$0xff]  }
  0x81   :  { %955 = vmatprep.subr.bf16.mxu0 %v1676_v42  ;;  %1531 = vmatpush3.bf16.msra.mxu1 %v1795_v37 }
  0x82   :  { %1532 = vmatprep.subr.bf16.mxu1 %v1796_v38 }
  0x84   :  { %956 = vmatpush1.bf16.msra.mxu0 %v1674_v44 }
  0x85   :  { %957 = vmatprep.subr.bf16.mxu0 %v1679_v46  ;;  %1533 = vmatpush3.bf16.msra.mxu1 %v1797_v39  ;;  %v196_v46 = vshrl.u32 %v195_v45, 7 }
  0x86   :  { %1549 = vmatprep.subr.bf16.mxu1 %v1841_v40 }
  0x87   :  { %v197_v47 = vsub.s32 0, %v196_v46  ;;  %v201_v49 = vsub.s32 1, %v196_v46 }
  0x88   :  { %958 = vmatpush1.bf16.msra.mxu0 %v1677_v48  ;;  %v193_v48 = vld [vmem:[%s2038_s2] sm:$0x3] }
  0x89   :  { %959 = vmatprep.subr.bf16.mxu0 %v1682_v50  ;;  %v198_v50 = vrot.slane %v193_v48, %v197_v47  ;;  %v202_v51 = vrot.slane %v193_v48, %v201_v49 }
  0x8c   :  { %960 = vmatpush1.bf16.msra.mxu0 %v1680_v52 }
  0x8d   :  { %961 = vmatprep.subr.bf16.mxu0 %v1688_v53 }
  0x90   :  { %962 = vmatpush1.bf16.msra.mxu0 %v1686_v54 }
  0x91   :  { %974 = vmatprep.subr.bf16.mxu0 %v1694_v57 }
  0x93   :  { %964 = vmatmul.mubr.bf16.vlgmr.msra.gmra.mrb[0].mxu0 %v61_v60 }
  0x94   :  { %975 = vmatpush1.bf16.msra.mxu0 %v1692_v61  ;;  %1006 = vmatprep.mubr.bf16.mxu0 %v64_v62 }
  0x95   :  { %976 = vmatprep.subr.bf16.mxu0 %v1700_v63 }
  0x98   :  { %977 = vmatpush1.bf16.msra.mxu0 %v1698_v0 }
  0x99   :  { %978 = vmatprep.subr.bf16.mxu0 %v1706_v1 }
  0x9c   :  { %979 = vmatpush1.bf16.msra.mxu0 %v1704_v2 }
  0x9d   :  { %980 = vmatprep.subr.bf16.mxu0 %v1712_v3 }
  0xa0   :  { %981 = vmatpush1.bf16.msra.mxu0 %v1710_v4 }
  0xa1   :  { %982 = vmatprep.subr.bf16.mxu0 %v1718_v5 }
  0xa4   :  { %983 = vmatpush1.bf16.msra.mxu0 %v1716_v6 }
  0xa5   :  { %984 = vmatprep.subr.bf16.mxu0 %v1724_v7 }
  0xa8   :  { %985 = vmatpush1.bf16.msra.mxu0 %v1722_v8 }
  0xa9   :  { %986 = vmatprep.subr.bf16.mxu0 %v1730_v9 }
  0xac   :  { %987 = vmatpush1.bf16.msra.mxu0 %v1728_v10  ;;  %v1798_v10 = vld [vmem:[%s2041_s5] sm:$0xff]  }
  0xad   :  { %988 = vmatprep.subr.bf16.mxu0 %v1736_v11  ;;  %v1799_v11 = vld [vmem:[%s2041_s5 + $0x8] sm:$0xff]  }
  0xb0   :  { %989 = vmatpush1.bf16.msra.mxu0 %v1734_v12  ;;  %v1800_v12 = vld [vmem:[%s2041_s5 + $0x10] sm:$0xff]  }
  0xb1   :  { %990 = vmatprep.subr.bf16.mxu0 %v1742_v13  ;;  %v1801_v13 = vld [vmem:[%s2041_s5 + $0x18] sm:$0xff]  }
  0xb4   :  { %991 = vmatpush1.bf16.msra.mxu0 %v1740_v14  ;;  %v1802_v14 = vld [vmem:[%s2041_s5 + $0x20] sm:$0xff]  }
  0xb5   :  { %992 = vmatprep.subr.bf16.mxu0 %v1748_v15  ;;  %v1803_v15 = vld [vmem:[%s2041_s5 + $0x28] sm:$0xff]  }
  0xb8   :  { %993 = vmatpush1.bf16.msra.mxu0 %v1746_v16  ;;  %v1804_v16 = vld [vmem:[%s2041_s5 + $0x30] sm:$0xff]  }
  0xb9   :  { %994 = vmatprep.subr.bf16.mxu0 %v1754_v17  ;;  %v1805_v17 = vld [vmem:[%s2041_s5 + $0x38] sm:$0xff]  }
  0xbc   :  { %995 = vmatpush1.bf16.msra.mxu0 %v1752_v18 }
  0xbd   :  { %996 = vmatprep.subr.bf16.mxu0 %v1760_v19  ;;  %v1481_v19 = vld [vmem:[%s2040_s4] ss:$0 sm:$0xff] }
  0xc0   :  { %997 = vmatpush1.bf16.msra.mxu0 %v1758_v20 }
  0xc1   :  { %998 = vmatprep.subr.bf16.mxu0 %v1766_v21 }
  0xc4   :  { %999 = vmatpush1.bf16.msra.mxu0 %v1764_v22 }
  0xc5   :  { %1000 = vmatprep.subr.bf16.mxu0 %v1772_v23 }
  0xc8   :  { %1001 = vmatpush1.bf16.msra.mxu0 %v1770_v24 }
  0xc9   :  { %1002 = vmatprep.subr.bf16.mxu0 %v1778_v25 }
  0xcc   :  { %1003 = vmatpush1.bf16.msra.mxu0 %v1776_v26 }
  0xcd   :  { %1004 = vmatprep.subr.bf16.mxu0 %v1781_v27 }
  0xd0   :  { %1005 = vmatpush1.bf16.msra.mxu0 %v1779_v28 }
  0xd3   :  { %1007 = vmatmul.mubr.bf16.vlgmr.msra.gmra.mrb[0].mxu0 %v63_v31 }
 0x12d   :  { %v879_v41 = vpop.f32.mrb[0].mxu1 }
 0x12e   :  { %v881_v42 = vpop.f32.mrb[1].mxu1  ;;  %v880_v52 = vadd.f32 %v879_v41, %v198_v50 }
 0x12f   :  { %v883_v43 = vpop.f32.mrb[2].mxu1  ;;  %v882_v53 = vadd.f32 %v881_v42, %v202_v51 }
 0x130   :  { %v885_v44 = vpop.f32.mrb[3].mxu1  ;;  %v884_v55 = vadd.f32 %v883_v43, %v198_v50 }
 0x131   :  { %v886_v58 = vadd.f32 %v885_v44, %v202_v51 }
 0x1a6   :  { %v1008_v54 = vpop.f32.mrb[0].mxu0 }
 0x1a7   :  { %v1570_v56 = vadd.f32 %v1008_v54, %v880_v52  ;;  %v1010_v57 = vpop.f32.mrb[1].mxu0 }
 0x1a8   :  { %v1572_v59 = vadd.f32 %v1010_v57, %v882_v53  ;;  %v1012_v60 = vpop.f32.mrb[2].mxu0 }
 0x1a9   :  { %v1021_v61 = vmul.f32 0.2, %v1570_v56  ;;  %v1574_v62 = vadd.f32 %v1012_v60, %v884_v55  ;;  %v1014_v63 = vpop.f32.mrb[3].mxu0  ;;  %vm1017_vm0 = vcmp.gt.f32.partialorder %v1570_v56, 0.0 }
 0x1aa   :  { %v1022_v0 = vmul.f32 0.2, %v1572_v59  ;;  %v1576_v1 = vadd.f32 %v1014_v63, %v886_v58  ;;  %vm1018_vm1 = vcmp.gt.f32.partialorder %v1572_v59, 0.0 }
 0x1ab   :  { %vm1019_vm2 = vcmp.gt.f32.partialorder %v1574_v62, 0.0  ;;  %v1023_v2 = vmul.f32 0.2, %v1574_v62  ;;  %v1025_v4 = vsel %vm1017_vm0, %v1570_v56, %v1021_v61 }
 0x1ac   :  { %vm1020_vm3 = vcmp.gt.f32.partialorder %v1576_v1, 0.0  ;;  %v1024_v3 = vmul.f32 0.2, %v1576_v1  ;;  %v1026_v7 = vsel %vm1018_vm1, %v1572_v59, %v1022_v0 }
 0x1ad   :  { %v1027_v5 = vsel %vm1019_vm2, %v1574_v62, %v1023_v2 }
 0x1ae   :  { %v1029_v6 = vpack.c.bf16 %v1027_v5, %v1025_v4  ;;  %v1028_v8 = vsel %vm1020_vm3, %v1576_v1, %v1024_v3 }
 0x1af   :  { %v1030_v9 = vpack.c.bf16 %v1028_v8, %v1026_v7 }
 0x1b1   :  { %1198 = vmatprep.mubr.bf16.mxu1 %v1030_v9 }
 0x1b2   :  { %1199 = vmatmul.mubr.bf16.vlgmr.msra.gmra.mrb[4].mxu1 %v1029_v6 }
 0x1b3   :  { %1550 = vmatpush3.bf16.msra.mxu1 %v1798_v10  ;;  %1565 = vmatprep.mubr.msk.bf16.mxu1 %vm1842_vm4, %v1841_v40 }
 0x1b4   :  { %1551 = vmatprep.subr.bf16.mxu1 %v1841_v40 }
 0x1b7   :  { %1552 = vmatpush3.bf16.msra.mxu1 %v1799_v11 }
 0x1b8   :  { %1553 = vmatprep.subr.bf16.mxu1 %v1841_v40 }
 0x1bb   :  { %1554 = vmatpush3.bf16.msra.mxu1 %v1800_v12 }
 0x1bc   :  { %1555 = vmatprep.subr.bf16.mxu1 %v1841_v40 }
 0x1bf   :  { %1556 = vmatpush3.bf16.msra.mxu1 %v1801_v13 }
 0x1c0   :  { %1557 = vmatprep.subr.bf16.mxu1 %v1841_v40 }
 0x1c3   :  { %1558 = vmatpush3.bf16.msra.mxu1 %v1802_v14 }
 0x1c4   :  { %1559 = vmatprep.subr.bf16.mxu1 %v1841_v40 }
 0x1c7   :  { %1560 = vmatpush3.bf16.msra.mxu1 %v1803_v15 }
 0x1c8   :  { %1561 = vmatprep.subr.bf16.mxu1 %v1841_v40 }
 0x1cb   :  { %1562 = vmatpush3.bf16.msra.mxu1 %v1804_v16 }
 0x1cc   :  { %1563 = vmatprep.subr.bf16.mxu1 %v1841_v40 }
 0x1cf   :  { %1564 = vmatpush3.bf16.msra.mxu1 %v1805_v17 }
 0x285   :  { %v1534_v18 = vpop.f32.mrb[4].mxu1 }
 0x286   :  { %v1535_v20 = vpop.f32.mrb[5].mxu1 }
 0x287   :  { %v1536_v21 = vadd.f32 %v1535_v20, %v1534_v18  ;;  %v1537_v22 = vpop.f32.mrb[6].mxu1 }
 0x288   :  { %v1538_v23 = vpop.f32.mrb[7].mxu1 }
 0x289   :  { %v1201_v24 = vadd.f32 %v1536_v21, %v1481_v19  ;;  %v1539_v25 = vadd.f32 %v1538_v23, %v1537_v22 }
 0x28b   :  { %v1209_v26 = vmul.f32 0.2, %v1201_v24  ;;  %v1204_v27 = vadd.f32 %v1539_v25, %v1481_v19  ;;  %vm1207_vm5 = vcmp.gt.f32.partialorder %v1201_v24, 0.0 }
 0x28d   :  { %vm1208_vm6 = vcmp.gt.f32.partialorder %v1204_v27, 0.0  ;;  %v1210_v28 = vmul.f32 0.2, %v1204_v27  ;;  %v1211_v29 = vsel %vm1207_vm5, %v1201_v24, %v1209_v26 }
 0x28f   :  { %v1212_v30 = vsel %vm1208_vm6, %v1204_v27, %v1210_v28 }
 0x290   :  { %v1213_v31 = vpack.c.bf16 %v1212_v30, %v1211_v29 }
 0x292   :  { %1566 = vmatmul.mubr.bf16.vlgmr.msra.gmra.mrb[8].mxu1 %v1213_v31 }
 0x365   :  { %v1319_v33 = vpop.f32.mrb[8].mxu1 }
 0x366   :  { %v1320_v34 = vadd.f32 %v1498_v32, %v1319_v33  ;;  %v1567_v35 = vpop.f32.mrb[9].mxu1 }
 0x367   :  { %v1322_v36 = vpop.f32.mrb[10].mxu1 }
 0x368   :  { %v1507_v37 = vmul.f32 -1.442695, %v1320_v34  ;;  %v1323_v38 = vadd.f32 %v1498_v32, %v1322_v36  ;;  %v1568_v39 = vpop.f32.mrb[11].mxu1 }
 0x36a   :  { %1806 = vpow2.f32 %v1507_v37  ;;  %v1508_v40 = vmul.f32 -1.442695, %v1323_v38 }
 0x36c   :  { %1808 = vpow2.f32 %v1508_v40 }
 0x374   :  { %v1807_v41 = vpop.eup %1806 }
 0x375   :  { %v1332_v42 = vadd.f32 1.0, %v1807_v41 }
 0x376   :  { %v1809_v43 = vpop.eup %1808 }
 0x377   :  { %v1333_v44 = vadd.f32 1.0, %v1809_v43  ;;  %1810 = vrcp.f32 %v1332_v42 }
 0x379   :  { %1812 = vrcp.f32 %v1333_v44 }
 0x381   :  { %v1811_v45 = vpop.eup %1810 }
 0x383   :  { %v1813_v46 = vpop.eup %1812 }
 0x384   :  { %v1516_v47 = vpack.c.bf16 %v1813_v46, %v1811_v45 }
 0x386   :  { %1517 = vst [vmem:[%s2043_s7] sm:$0xff] %v1516_v47  }
 0x387   :  { %1352 = vsyncpa [#allocation3], 1 }

</bundles_post_ra>
